<compile_context>
chip_gen: v7x
topology: tpu7x:2x2x1
jax: 0.10.0
libtpu: 0.0.40
codegen_flags: <defaults>
</compile_context>

<pallas_src>
import jax
import jax.numpy as jnp
from jax.experimental import pallas as pl
from jax.experimental.pallas import tpu as pltpu


def mlp2_sigmoid_kernel(x_ref, w1_ref, b1_ref, w23_ref, b23_ref, o_ref):
    # fc1: cast the f32 input tile to bf16 in VMEM (single HBM read of x),
    # MXU matmul with f32 accumulation, f32 bias.
    xb = x_ref[...].astype(jnp.bfloat16)
    h1 = jnp.dot(xb, w1_ref[...],
                 preferred_element_type=jnp.float32) + b1_ref[...]
    # Exact sigmoid: exp on the EUP + exact divide (HBM-bound => free).
    s = 1.0 / (1.0 + jnp.exp(-h1))
    # Folded fc2 @ fc10: (TB,16)bf16 @ (16,10)bf16 -> f32, + folded bias.
    out = jnp.dot(s.astype(jnp.bfloat16), w23_ref[...],
                  preferred_element_type=jnp.float32) + b23_ref[...]
    o_ref[...] = out.astype(o_ref.dtype)


def _round_up(n, m):
    return ((n + m - 1) // m) * m


def mlp2_sigmoid_forward(x_nchw, params, *, tb=4096):
    """x_nchw: (B, 1, 28, 28) float32.  Returns (B, 10) float32 logits."""
    w1, b1, w2, b2, w3, b3 = params
    B = x_nchw.shape[0]
    x = x_nchw.reshape(B, 784)              # x.view(-1, 784); stays f32

    # Fold fc2 + fc10 (no nonlinearity between them): exact up to rounding.
    w23 = w2 @ w3                            # (16, 10) f32
    b23 = b2 @ w3 + b3                       # (1, 10)  f32

    # Weights are tiny and VMEM-resident; bf16 feeds the MXU in one pass.
    w1_b = w1.astype(jnp.bfloat16)
    w23_b = w23.astype(jnp.bfloat16)

    # Batch tile: multiple of 8 sublanes, large enough to amortize per-step
    # overhead, small enough (with headroom) for every generation's VMEM.
    TB = min(tb, _round_up(B, 8))
    grid = (pl.cdiv(B, TB),)                 # partial last block, no jnp.pad

    # Size the scoped VMEM limit from the actual footprint:
    #   2x double-buffered f32 input tile + 2x output tile + 2x weights/biases.
    weight_bytes = (784 * 16 + 16 + 16 * 10 + 10) * 4
    vmem_needed = 2 * TB * 784 * 4 + 2 * TB * 10 * 4 + 2 * weight_bytes
    vmem_limit = min(max(vmem_needed + (4 << 20), 16 << 20), 48 << 20)

    def weight_spec(shape):
        # Weights/biases stay resident in VMEM across all grid steps.
        return pl.BlockSpec(shape, lambda i: (0, 0))

    n_weight_elems = 784 * 16 + 16 * 10
    cost = pl.CostEstimate(
        flops=2 * B * n_weight_elems,
        transcendentals=B * 16,                        # exp in the sigmoid
        bytes_accessed=(B * 784 * 4                    # f32 input stream
                        + B * 10 * 4                   # f32 output
                        + n_weight_elems * 2           # bf16 weights
                        + (16 + 10) * 4),              # f32 biases
    )

    out = pl.pallas_call(
        mlp2_sigmoid_kernel,
        out_shape=jax.ShapeDtypeStruct((B, 10), jnp.float32),
        grid=grid,
        in_specs=[
            pl.BlockSpec((TB, 784), lambda i: (i, 0)),      # streamed f32 input
            weight_spec((784, 16)), weight_spec((1, 16)),   # fc1
            weight_spec((16, 10)), weight_spec((1, 10)),    # folded fc2@fc10
        ],
        out_specs=pl.BlockSpec((TB, 10), lambda i: (i, 0)),
        compiler_params=pltpu.CompilerParams(
            dimension_semantics=("parallel",),   # v7x: both TCs; no-op v5e/v6e
            vmem_limit_bytes=vmem_limit),
        cost_estimate=cost,
    )(x, w1_b, b1, w23_b, b23)

    return out


def init_params(key):
    """Deterministic init mimicking torch.nn.Linear default (uniform ±1/sqrt(fan_in)).
    Weights stored as (in_features, out_features) so every layer is x @ W + b."""
    def linear(key, fan_in, fan_out):
        kw, kb = jax.random.split(key)
        bound = 1.0 / jnp.sqrt(fan_in)
        w = jax.random.uniform(kw, (fan_in, fan_out), jnp.float32, -bound, bound)
        b = jax.random.uniform(kb, (1, fan_out), jnp.float32, -bound, bound)
        return w, b

    k1, k2, k3 = jax.random.split(key, 3)
    w1, b1 = linear(k1, 784, 16)
    w2, b2 = linear(k2, 16, 64)
    w3, b3 = linear(k3, 64, 10)
    return (w1, b1, w2, b2, w3, b3)


def reference_forward(x_nchw, params):
    # Pure-f32 reference matching the PyTorch module (two separate linears).
    w1, b1, w2, b2, w3, b3 = params
    x = x_nchw.reshape(x_nchw.shape[0], 784)
    h1 = x @ w1 + b1
    s = jax.nn.sigmoid(h1)
    h2 = s @ w2 + b2
    return h2 @ w3 + b3


if __name__ == "__main__":
    key = jax.random.PRNGKey(0)
    kx, kp = jax.random.split(key)

    # MNIST-like input: batch=2, NCHW (2, 1, 28, 28)
    x = jax.random.normal(kx, (2, 1, 28, 28), dtype=jnp.float32)
    params = init_params(kp)

    out = mlp2_sigmoid_forward(x, params)
    out = jax.block_until_ready(out)

    ref = reference_forward(x, params)
    assert out.shape == (2, 10)
    # bf16 MXU feeds + folded fc2/fc10 => small rounding differences vs f32 ref.
    assert jnp.allclose(out, ref, atol=3e-2, rtol=3e-2), (
        f"max abs err {jnp.max(jnp.abs(out - ref))}")

    print("KERNEL_OK")
</pallas_src>

<mosaic_0001>
module attributes {stable_mosaic.version = 11 : i64} {
  func.func @mlp2_sigmoid_kernel(%arg0: i32, %arg1: memref<8x784xf32, #tpu.memory_space<vmem>>, %arg2: memref<784x16xbf16, #tpu.memory_space<vmem>>, %arg3: memref<1x16xf32, #tpu.memory_space<vmem>>, %arg4: memref<16x10xbf16, #tpu.memory_space<vmem>>, %arg5: memref<1x10xf32, #tpu.memory_space<vmem>>, %arg6: memref<8x10xf32, #tpu.memory_space<vmem>>) attributes {dimension_semantics = [#tpu.dimension_semantics<parallel>], iteration_bounds = array<i64: 1>, scalar_prefetch = 0 : i64, scratch_operands = 0 : i64, tpu.core_type = #tpu.core_type<tc>, window_params = [{transform_indices = @transform_0, window_bounds = array<i64: 8, 784>}, {pipeline_mode = #tpu.pipeline_mode<synchronous>, transform_indices = @transform_1, window_bounds = array<i64: 784, 16>}, {pipeline_mode = #tpu.pipeline_mode<synchronous>, transform_indices = @transform_2, window_bounds = array<i64: 1, 16>}, {pipeline_mode = #tpu.pipeline_mode<synchronous>, transform_indices = @transform_3, window_bounds = array<i64: 16, 10>}, {pipeline_mode = #tpu.pipeline_mode<synchronous>, transform_indices = @transform_4, window_bounds = array<i64: 1, 10>}, {transform_indices = @transform_5, window_bounds = array<i64: 8, 10>}]} {
    %c0 = arith.constant 0 : index
    %c0_0 = arith.constant 0 : index
    %0 = vector.load %arg1[%c0, %c0_0] : memref<8x784xf32, #tpu.memory_space<vmem>>, vector<8x784xf32>
    %1 = arith.truncf %0 : vector<8x784xf32> to vector<8x784xbf16>
    %c0_1 = arith.constant 0 : index
    %c0_2 = arith.constant 0 : index
    %2 = vector.load %arg2[%c0_1, %c0_2] : memref<784x16xbf16, #tpu.memory_space<vmem>>, vector<784x16xbf16>
    %cst = arith.constant dense<0.000000e+00> : vector<8x16xf32>
    %3 = tpu.matmul %1, %2, %cst {dimension_numbers = #tpu.dot_dimension_numbers<[1], [0], [0], [1], [0, 0, 1, 1], [], []>} : vector<8x784xbf16>, vector<784x16xbf16>, vector<8x16xf32> -> vector<8x16xf32>
    %c0_3 = arith.constant 0 : index
    %c0_4 = arith.constant 0 : index
    %4 = vector.load %arg3[%c0_3, %c0_4] : memref<1x16xf32, #tpu.memory_space<vmem>>, vector<1x16xf32>
    %5 = vector.broadcast %4 : vector<1x16xf32> to vector<8x16xf32>
    %6 = arith.addf %3, %5 : vector<8x16xf32>
    %cst_5 = arith.constant 0.000000e+00 : f32
    %7 = vector.broadcast %cst_5 : f32 to vector<8x16xf32>
    %8 = arith.subf %7, %6 : vector<8x16xf32>
    %9 = math.exp %8 : vector<8x16xf32>
    %cst_6 = arith.constant 1.000000e+00 : f32
    %10 = vector.broadcast %cst_6 : f32 to vector<8x16xf32>
    %11 = arith.addf %10, %9 : vector<8x16xf32>
    %cst_7 = arith.constant 1.000000e+00 : f32
    %12 = vector.broadcast %cst_7 : f32 to vector<8x16xf32>
    %13 = arith.divf %12, %11 : vector<8x16xf32>
    %14 = arith.truncf %13 : vector<8x16xf32> to vector<8x16xbf16>
    %c0_8 = arith.constant 0 : index
    %c0_9 = arith.constant 0 : index
    %15 = vector.load %arg4[%c0_8, %c0_9] : memref<16x10xbf16, #tpu.memory_space<vmem>>, vector<16x10xbf16>
    %cst_10 = arith.constant dense<0.000000e+00> : vector<8x10xf32>
    %16 = tpu.matmul %14, %15, %cst_10 {dimension_numbers = #tpu.dot_dimension_numbers<[1], [0], [0], [1], [0, 0, 1, 1], [], []>} : vector<8x16xbf16>, vector<16x10xbf16>, vector<8x10xf32> -> vector<8x10xf32>
    %c0_11 = arith.constant 0 : index
    %c0_12 = arith.constant 0 : index
    %17 = vector.load %arg5[%c0_11, %c0_12] : memref<1x10xf32, #tpu.memory_space<vmem>>, vector<1x10xf32>
    %18 = vector.broadcast %17 : vector<1x10xf32> to vector<8x10xf32>
    %19 = arith.addf %16, %18 : vector<8x10xf32>
    %c0_13 = arith.constant 0 : index
    %c0_14 = arith.constant 0 : index
    %20 = vector.load %arg6[%c0_13, %c0_14] : memref<8x10xf32, #tpu.memory_space<vmem>>, vector<8x10xf32>
    tpu.vector_store %arg6[%c0_13, %c0_14], %19 {strides = array<i32>} : memref<8x10xf32, #tpu.memory_space<vmem>>, vector<8x10xf32>,
    return
  }
  func.func @transform_0(%arg0: i32) -> (i32, i32) {
    %c0_i32 = arith.constant 0 : i32
    %c0_i32_0 = arith.constant 0 : i32
    return %arg0, %c0_i32 : i32, i32
  }
  func.func @transform_1(%arg0: i32) -> (i32, i32) {
    %c0_i32 = arith.constant 0 : i32
    %c0_i32_0 = arith.constant 0 : i32
    %c0_i32_1 = arith.constant 0 : i32
    return %c0_i32, %c0_i32_0 : i32, i32
  }
  func.func @transform_2(%arg0: i32) -> (i32, i32) {
    %c0_i32 = arith.constant 0 : i32
    %c0_i32_0 = arith.constant 0 : i32
    %c0_i32_1 = arith.constant 0 : i32
    return %c0_i32, %c0_i32_0 : i32, i32
  }
  func.func @transform_3(%arg0: i32) -> (i32, i32) {
    %c0_i32 = arith.constant 0 : i32
    %c0_i32_0 = arith.constant 0 : i32
    %c0_i32_1 = arith.constant 0 : i32
    return %c0_i32, %c0_i32_0 : i32, i32
  }
  func.func @transform_4(%arg0: i32) -> (i32, i32) {
    %c0_i32 = arith.constant 0 : i32
    %c0_i32_0 = arith.constant 0 : i32
    %c0_i32_1 = arith.constant 0 : i32
    return %c0_i32, %c0_i32_0 : i32, i32
  }
  func.func @transform_5(%arg0: i32) -> (i32, i32) {
    %c0_i32 = arith.constant 0 : i32
    %c0_i32_0 = arith.constant 0 : i32
    return %arg0, %c0_i32 : i32, i32
  }
}

</mosaic_0001>

<bundles_post_ra>
// kernel: tpu_custom_call.1
= control target key start
LH: loop header
LB: loop body
LE: loop exit
PB: predicated region body
PF: predicated region fallthrough
CT: control target
= control target key end

     0   :  { %10 = vsyncpa [#allocation3], 0  ;;  %v45_v28 = vlaneseq  ;;  %v1001_v33 = vmov 1983009808   ;;  %v1002_v43 = vmov 0.0   ;;  %vm1003_vm0 = vmmov 0   ;;  %s1233_s0 = inlined_call_operand.vmem [shape: f32[2,784], index: 0, kind: input, shape index: {}]   ;;  %s1234_s1 = inlined_call_operand.vmem [shape: bf16[784,16], index: 1, kind: input, shape index: {}]   ;;  %s1235_s2 = inlined_call_operand.vmem [shape: f32[1,16], index: 2, kind: input, shape index: {}]   ;;  %s1236_s3 = inlined_call_operand.vmem [shape: bf16[16,10], index: 3, kind: input, shape index: {}]   ;;  %s1237_s4 = inlined_call_operand.vmem [shape: f32[1,10], index: 4, kind: input, shape index: {}]   ;;  %s1238_s5 = inlined_call_operand.hbm [shape: f32[2,10], index: 5, kind: output, shape index: {}]  }
   0x1   :  { %v911_v0 = vld [vmem:[%s1234_s1 + $0x40] sm:$0xff]   ;;  %v915_v4 = vld [vmem:[%s1234_s1 + $0x48] sm:$0xff]   ;;  %v919_v8 = vld [vmem:[%s1234_s1 + $0x50] sm:$0xff]   ;;  %v43_v34 = vunpack.c.l.s4 %v1001_v33  ;;  %vm522_vm1 = vcmask 130048   ;;  %vm751_vm2 = vcmask 80896  }
   0x2   :  { %v912_v1 = vld [vmem:[%s1234_s1] sm:$0xff]   ;;  %823 = vmatprep.subr.bf16.mxu0 %v911_v0  ;;  %v916_v5 = vld [vmem:[%s1234_s1 + $0x8] sm:$0xff]   ;;  %v920_v9 = vld [vmem:[%s1234_s1 + $0x10] sm:$0xff]   ;;  %v46_v35 = vshrl.u32 %v45_v28, 7 }
   0x3   :  { %v913_v2 = vld [vmem:[%s1234_s1 + $0xc0] sm:$0xff]   ;;  %824 = vmatpush3.bf16.msra.mxu0 %v912_v1  ;;  %v917_v6 = vld [vmem:[%s1234_s1 + $0xc8] sm:$0xff]   ;;  %v921_v10 = vld [vmem:[%s1234_s1 + $0xd0] sm:$0xff]   ;;  %v44_v37 = vunpack.c.0.s8 %v43_v34 }
   0x4   :  { %v914_v3 = vld [vmem:[%s1234_s1 + $0x80] sm:$0xff]   ;;  %845 = vmatprep.subr.bf16.mxu1 %v913_v2  ;;  %825 = vmatprep.subr.bf16.mxu0 %v915_v4  ;;  %v918_v7 = vld [vmem:[%s1234_s1 + $0x88] sm:$0xff]   ;;  %v922_v11 = vld [vmem:[%s1234_s1 + $0x90] sm:$0xff]  }
   0x5   :  { %846 = vmatpush3.bf16.msra.mxu1 %v914_v3  ;;  %v923_v12 = vld [vmem:[%s1234_s1 + $0x58] sm:$0xff]   ;;  %v927_v16 = vld [vmem:[%s1234_s1 + $0x60] sm:$0xff]   ;;  %v931_v20 = vld [vmem:[%s1234_s1 + $0x68] sm:$0xff]   ;;  %v47_v42 = vsub.s32 %v44_v37, %v46_v35 }
   0x6   :  { %847 = vmatprep.subr.bf16.mxu1 %v917_v6  ;;  %v924_v13 = vld [vmem:[%s1234_s1 + $0x18] sm:$0xff]   ;;  %v928_v17 = vld [vmem:[%s1234_s1 + $0x20] sm:$0xff]   ;;  %v932_v21 = vld [vmem:[%s1234_s1 + $0x28] sm:$0xff]  }
   0x7   :  { %826 = vmatpush3.bf16.msra.mxu0 %v916_v5  ;;  %v925_v14 = vld [vmem:[%s1234_s1 + $0xd8] sm:$0xff]   ;;  %v929_v18 = vld [vmem:[%s1234_s1 + $0xe0] sm:$0xff]   ;;  %v933_v22 = vld [vmem:[%s1234_s1 + $0xe8] sm:$0xff]  }
   0x8   :  { %827 = vmatprep.subr.bf16.mxu0 %v919_v8  ;;  %v926_v15 = vld [vmem:[%s1234_s1 + $0x98] sm:$0xff]   ;;  %v930_v19 = vld [vmem:[%s1234_s1 + $0xa0] sm:$0xff]   ;;  %v934_v23 = vld [vmem:[%s1234_s1 + $0xa8] sm:$0xff]  }
   0x9   :  { %848 = vmatpush3.bf16.msra.mxu1 %v918_v7  ;;  %v935_v24 = vld [vmem:[%s1234_s1 + $0x70] sm:$0xff]   ;;  %v939_v29 = vld [vmem:[%s1234_s1 + $0x78] sm:$0xff]   ;;  %v947_v39 = vld [vmem:[%s1234_s1 + $0x140] sm:$0xff]  }
   0xa   :  { %849 = vmatprep.subr.bf16.mxu1 %v921_v10  ;;  %v936_v25 = vld [vmem:[%s1234_s1 + $0x30] sm:$0xff]   ;;  %v940_v30 = vld [vmem:[%s1234_s1 + $0x38] sm:$0xff]   ;;  %v950_v55 = vld [vmem:[%s1234_s1 + $0x100] sm:$0xff]  }
   0xb   :  { %828 = vmatpush3.bf16.msra.mxu0 %v920_v9  ;;  %v937_v26 = vld [vmem:[%s1234_s1 + $0xf0] sm:$0xff]   ;;  %v941_v31 = vld [vmem:[%s1234_s1 + $0xf8] sm:$0xff]   ;;  %v951_v57 = vld [vmem:[%s1234_s1 + $0x148] sm:$0xff]  }
   0xc   :  { %829 = vmatprep.subr.bf16.mxu0 %v923_v12  ;;  %v938_v27 = vld [vmem:[%s1234_s1 + $0xb0] sm:$0xff]   ;;  %v944_v36 = vld [vmem:[%s1233_s0 + $0x1c] ss:$14 sps:$4 sm:$0xff]   ;;  %v965_v62 = vld [vmem:[%s1234_s1 + $0x180] sm:$0xff]  }
   0xd   :  { %850 = vmatpush3.bf16.msra.mxu1 %v922_v11  ;;  %v942_v32 = vld [vmem:[%s1233_s0] ss:$14 sps:$4 sm:$0xff]   ;;  %v946_v38 = vld [vmem:[%s1234_s1 + $0xb8] sm:$0xff]   ;;  %v948_v40 = vld [vmem:[%s1233_s0 + $0x4] ss:$14 sps:$4 sm:$0xff]   ;;  %v62_v45 = vrot.slane %v944_v36, %v47_v42 }
   0xe   :  { %851 = vmatprep.subr.bf16.mxu1 %v925_v14  ;;  %v949_v41 = vld [vmem:[%s1233_s0 + $0x20] ss:$14 sps:$4 sm:$0xff]   ;;  %v48_v44 = vrot.slane %v942_v32, %v47_v42  ;;  %v55_v46 = vrot.slane %v948_v40, %v47_v42  ;;  %v955_v61 = vld [vmem:[%s1234_s1 + $0x158] sm:$0xff]   ;;  %v969_v1 = vld [vmem:[%s1233_s0 + $0x24] ss:$14 sps:$4 sm:$0xff]  }
   0xf   :  { %830 = vmatpush3.bf16.msra.mxu0 %v924_v13  ;;  %v69_v47 = vrot.slane %v949_v41, %v47_v42  ;;  %v952_v58 = vld [vmem:[%s1234_s1 + $0x108] sm:$0xff]   ;;  %v953_v59 = vld [vmem:[%s1234_s1 + $0x150] sm:$0xff]   ;;  %v956_v63 = vld [vmem:[%s1234_s1 + $0x118] sm:$0xff]   ;;  %v98_v6 = vrot.slane %v969_v1, %v47_v42 }
  0x10   :  { %831 = vmatprep.subr.bf16.mxu0 %v927_v16  ;;  %v71_v48 = vcombine.high %v48_v44, %v62_v45  ;;  %v70_v49 = vcombine.low %v48_v44, %v62_v45  ;;  %v954_v60 = vld [vmem:[%s1234_s1 + $0x110] sm:$0xff]   ;;  %v968_v2 = vld [vmem:[%s1233_s0 + $0xc] ss:$14 sps:$4 sm:$0x33]   ;;  %v957_v4 = vld [vmem:[%s1234_s1 + $0x160] sm:$0xff]  }
  0x11   :  { %852 = vmatpush3.bf16.msra.mxu1 %v926_v15  ;;  %v73_v50 = vcombine.high %v55_v46, %v69_v47  ;;  %v72_v51 = vcombine.low %v55_v46, %v69_v47  ;;  %v966_v0 = vld [vmem:[%s1233_s0 + $0x8] ss:$14 sps:$4 sm:$0xff]   ;;  %v91_v7 = vrot.slane %v968_v2, %v47_v42  ;;  %v958_v10 = vld [vmem:[%s1234_s1 + $0x120] sm:$0xff]  }
  0x12   :  { %853 = vmatprep.subr.bf16.mxu1 %v929_v18  ;;  %v117_v52 = vpack.c.bf16 %v71_v48, %v71_v48  ;;  %v116_v53 = vpack.c.bf16 %v70_v49, %v70_v49  ;;  %v971_v3 = vld [vmem:[%s1233_s0 + $0x28] ss:$14 sps:$4 sm:$0x33]   ;;  %v84_v5 = vrot.slane %v966_v0, %v47_v42  ;;  %v963_v18 = vld [vmem:[%s1234_s1 + $0x178] sm:$0xff]  }
  0x13   :  { %832 = vmatpush3.bf16.msra.mxu0 %v928_v17  ;;  %v119_v54 = vpack.c.bf16 %v73_v50, %v73_v50  ;;  %v118_v56 = vpack.c.bf16 %v72_v51, %v72_v51  ;;  %v105_v8 = vrot.slane %v971_v3, %v47_v42  ;;  %v959_v12 = vld [vmem:[%s1234_s1 + $0x168] sm:$0xff]   ;;  %v961_v16 = vld [vmem:[%s1234_s1 + $0x170] sm:$0xff]  }
  0x14   :  { %833 = vmatprep.subr.bf16.mxu0 %v931_v20  ;;  %558 = vmatprep.mubr.bf16.mxu0 %v117_v52  ;;  %v107_v9 = vcombine.high %v84_v5, %v98_v6  ;;  %v960_v15 = vld [vmem:[%s1234_s1 + $0x128] sm:$0xff]   ;;  %v962_v17 = vld [vmem:[%s1234_s1 + $0x130] sm:$0xff]   ;;  %v964_v20 = vld [vmem:[%s1234_s1 + $0x138] sm:$0xff]  }
  0x15   :  { %854 = vmatpush3.bf16.msra.mxu1 %v930_v19  ;;  %598 = vmatprep.mubr.bf16.mxu1 %v119_v54  ;;  %v108_v11 = vcombine.low %v91_v7, %v105_v8  ;;  %v106_v19 = vcombine.low %v84_v5, %v98_v6 }
  0x16   :  { %855 = vmatprep.subr.bf16.mxu1 %v933_v22  ;;  %v121_v13 = vpack.c.bf16 %v107_v9, %v107_v9  ;;  %v972_v22 = vld [vmem:[%s1236_s3] sm:$0xff]  }
  0x17   :  { %834 = vmatpush3.bf16.msra.mxu0 %v932_v21  ;;  %v122_v14 = vpack.c.bf16 %v108_v11, %v108_v11  ;;  %v120_v21 = vpack.c.bf16 %v106_v19, %v106_v19 }
  0x18   :  { %835 = vmatprep.subr.bf16.mxu0 %v935_v24 }
  0x19   :  { %856 = vmatpush3.bf16.msra.mxu1 %v934_v23 }
  0x1a   :  { %857 = vmatprep.subr.bf16.mxu1 %v937_v26 }
  0x1b   :  { %836 = vmatpush3.bf16.msra.mxu0 %v936_v25  ;;  %v769_v25 = vld [vmem:[%s1235_s2] ss:$0 sm:$0xff] }
  0x1c   :  { %837 = vmatprep.subr.bf16.mxu0 %v939_v29 }
  0x1d   :  { %858 = vmatpush3.bf16.msra.mxu1 %v938_v27 }
  0x1e   :  { %859 = vmatprep.subr.bf16.mxu1 %v941_v31 }
  0x1f   :  { %838 = vmatpush3.bf16.msra.mxu0 %v940_v30 }
  0x20   :  { %867 = vmatprep.subr.bf16.mxu0 %v947_v39 }
  0x21   :  { %860 = vmatpush3.bf16.msra.mxu1 %v946_v38 }
  0x22   :  { %893 = vmatprep.subr.bf16.mxu1 %v1002_v43  ;;  %559 = vmatmul.mubr.bf16.vlgmr.msra.gmra.mrb[0].mxu0 %v116_v53  ;;  %v820_v53 = vld [vmem:[%s1237_s4] ss:$0 sm:$0xff] }
  0x23   :  { %868 = vmatpush3.bf16.msra.mxu0 %v950_v55  ;;  %638 = vmatprep.mubr.bf16.mxu0 %v121_v13 }
  0x24   :  { %599 = vmatmul.mubr.bf16.vlgmr.msra.gmra.mrb[0].mxu1 %v118_v56  ;;  %869 = vmatprep.subr.bf16.mxu0 %v951_v57 }
  0x25   :  { %895 = vmatprep.mubr.msk.bf16.mxu1 %vm1003_vm0, %v1002_v43  ;;  %894 = vmatpush3.bf16.msra.mxu1 %v965_v62 }
  0x26   :  { %899 = vmatprep.subr.bf16.mxu1 %v1002_v43 }
  0x27   :  { %870 = vmatpush3.bf16.msra.mxu0 %v952_v58 }
  0x28   :  { %871 = vmatprep.subr.bf16.mxu0 %v953_v59 }
  0x2b   :  { %872 = vmatpush3.bf16.msra.mxu0 %v954_v60 }
  0x2c   :  { %873 = vmatprep.subr.bf16.mxu0 %v955_v61  ;;  %896 = vmatmul.mubr.msk.bf16.vlgmr.msra.gmra.mrb[4].mxu1 %vm522_vm1, %v122_v14 }
  0x2d   :  { %901 = vmatprep.mubr.msk.bf16.mxu1 %vm1003_vm0, %v1002_v43  ;;  %900 = vmatpush3.bf16.msra.mxu1 %v972_v22 }
  0x2f   :  { %874 = vmatpush3.bf16.msra.mxu0 %v956_v63 }
  0x30   :  { %875 = vmatprep.subr.bf16.mxu0 %v957_v4 }
  0x33   :  { %876 = vmatpush3.bf16.msra.mxu0 %v958_v10 }
  0x34   :  { %877 = vmatprep.subr.bf16.mxu0 %v959_v12 }
  0x37   :  { %878 = vmatpush3.bf16.msra.mxu0 %v960_v15 }
  0x38   :  { %879 = vmatprep.subr.bf16.mxu0 %v961_v16 }
  0x3b   :  { %880 = vmatpush3.bf16.msra.mxu0 %v962_v17 }
  0x3c   :  { %881 = vmatprep.subr.bf16.mxu0 %v963_v18 }
  0x3f   :  { %882 = vmatpush3.bf16.msra.mxu0 %v964_v20 }
  0x42   :  { %639 = vmatmul.mubr.bf16.vlgmr.msra.gmra.mrb[4].mxu0 %v120_v21 }
  0xf5   :  { %v839_v23 = vpop.f32.mrb[0].mxu0 }
  0xf6   :  { %v840_v26 = vpop.f32.mrb[1].mxu0 }
  0xf7   :  { %v861_v24 = vpop.f32.mrb[0].mxu1  ;;  %v841_v28 = vadd.f32 %v840_v26, %v839_v23  ;;  %v842_v29 = vpop.f32.mrb[2].mxu0 }
  0xf8   :  { %v862_v27 = vpop.f32.mrb[1].mxu1  ;;  %v843_v32 = vpop.f32.mrb[3].mxu0 }
  0xf9   :  { %v863_v30 = vadd.f32 %v862_v27, %v861_v24  ;;  %v864_v31 = vpop.f32.mrb[2].mxu1  ;;  %v561_v34 = vadd.f32 %v841_v28, %v769_v25 }
  0xfa   :  { %v865_v33 = vpop.f32.mrb[3].mxu1 }
  0xfb   :  { %v601_v35 = vadd.f32 %v863_v30, %v561_v34 }
  0xff   :  { %v680_v36 = vpop.f32.mrb[4].mxu1 }
 0x100   :  { %v897_v37 = vpop.f32.mrb[5].mxu1 }
 0x101   :  { %v683_v38 = vpop.f32.mrb[6].mxu1 }
 0x102   :  { %v898_v39 = vpop.f32.mrb[7].mxu1 }
 0x115   :  { %v883_v40 = vpop.f32.mrb[4].mxu0 }
 0x116   :  { %v884_v41 = vpop.f32.mrb[5].mxu0 }
 0x117   :  { %v885_v42 = vadd.f32 %v884_v41, %v883_v40  ;;  %v886_v43 = vpop.f32.mrb[6].mxu0 }
 0x118   :  { %v887_v44 = vpop.f32.mrb[7].mxu0 }
 0x119   :  { %v641_v45 = vadd.f32 %v885_v42, %v601_v35 }
 0x11b   :  { %v681_v46 = vadd.f32 %v680_v36, %v641_v45 }
 0x11d   :  { %v686_v47 = vsub.f32 0.0, %v681_v46 }
 0x11f   :  { %v687_v48 = vmul.f32 1.442695, %v686_v47 }
 0x121   :  { %973 = vpow2.f32 %v687_v48 }
 0x12b   :  { %v974_v49 = vpop.eup %973 }
 0x12c   :  { %v689_v50 = vadd.f32 1.0, %v974_v49 }
 0x12e   :  { %975 = vrcp.f32 %v689_v50 }
 0x138   :  { %v976_v51 = vpop.eup %975 }
 0x139   :  { %v692_v52 = vpack.c.bf16 %v976_v51, %v976_v51 }
 0x13b   :  { %902 = vmatmul.mubr.msk.bf16.vlgmr.msra.gmra.mrb[8].mxu1 %vm522_vm1, %v692_v52 }
 0x20e   :  { %v745_v54 = vpop.f32.mrb[8].mxu1 }
 0x20f   :  { %v746_v55 = vadd.f32 %v820_v53, %v745_v54  ;;  %v903_v56 = vpop.f32.mrb[9].mxu1 }
 0x210   :  { %v748_v57 = vpop.f32.mrb[10].mxu1 }
 0x211   :  { %752 = vst.msk [vmem:[#allocation2] sm:$0xff] %vm751_vm2, %v746_v55  ;;  %v904_v58 = vpop.f32.mrb[11].mxu1 }
 0x212   :  { %757 = vsyncadd [#allocation3], 96  ;;  %s1004_s3 = smov [#allocation2]  }
 0x213   :  { %s758_s10 = sshll.u32 %s1004_s3, 4  ;;  %s759_s10 = int_to_ptr.vmem [resolvable:$true] %s758_s10 }
 0x214   :  { %s977_s11 = scalar_lea.vmem %s759_s10, 32  ;;  %s981_s12 = scalar_lea.vmem %s759_s10, 128 }
 0x215   :  { %p978_p0 = scmp.ne.s32.totalorder %s759_s10, %s977_s11  ;;  %p982_p1 = scmp.lt.s32.totalorder %s759_s10, %s759_s10 }
 0x216   :  { %p983_p2 = scmp.lt.s32.totalorder %s981_s12, %s977_s11 }
 0x218   :  { %p984_p3 = por %p983_p2, %p982_p1 }
 0x21a   :  { %p985_p4 = pnand %p984_p3, %p978_p0 }
 0x21c   :  { %988 = shalt.err (!%p985_p4)
}
 0x21d   :  { %s989_s14 = scalar_lea.hbm %s1238_s5, 32 }
 0x21e   :  { %p990_p5 = scmp.ne.s32.totalorder %s1238_s5, %s989_s14  ;;  %p993_p6 = scmp.lt.u32.totalorder %s989_s14, %s1238_s5 }
 0x220   :  { %p995_p7 = pnand %p993_p6, %p990_p5 }
 0x222   :  { %998 = shalt.err (!%p995_p7)
}
 0x223   :  { %s1005_s19 = smov 32   ;;  %s1006_s20 = smov 2  }
 0x224   :  { %764 = dma.vmem_to_hbm [thread:$0]  %s759_s10, 32, %s1238_s5, [#allocation3], %s1005_s19, %s1005_s19, %s1006_s20  }
 0x225   :  { %999 = dma.done.wait [#allocation3], 128  }
 0x226   :  { %1000 = vsyncadd [#allocation3], 4294967168 }
 0x227   :  { %768 = vsyncpa [#allocation3], 1 }

</bundles_post_ra>
